<compile_context>
chip_gen: v5e
topology: v5e:2x2
jax: 0.10.0
libtpu: 0.0.40
codegen_flags: <defaults>
</compile_context>

<pallas_src>
import jax
import jax.numpy as jnp
from jax.experimental import pallas as pl
from jax.experimental.pallas import tpu as pltpu

LN_EPS = 1e-5


# ----------------------- Pallas kernel -----------------------

def _final_layer_kernel(x_ref, c_ref, mod_w_ref, mod_b_ref,
                        ln_w_ref, ln_b_ref, w_ref, b_ref, o_ref):
    H = x_ref.shape[-1]

    # --- fused adaLN-Zero modulation head: SiLU(c) @ W_mod + b_mod -> (1, 2H) ---
    c = c_ref[0].astype(jnp.float32)                              # (1, H)
    h = c * jax.nn.sigmoid(c)                                     # SiLU (EUP)
    gb = (jnp.dot(h.astype(mod_w_ref.dtype), mod_w_ref[...],
                  preferred_element_type=jnp.float32)
          + mod_b_ref[...].astype(jnp.float32))                   # (1, 2H)
    gamma = gb[:, :H]                                             # static slices
    beta = gb[:, H:]

    # Fold LN affine + modulation into one scale/shift pair (computed once/step):
    #   y = xhat*ln_w*(1+gamma) + ln_b*(1+gamma) + beta
    one_plus_gamma = 1.0 + gamma
    scale = ln_w_ref[...].astype(jnp.float32) * one_plus_gamma    # (1, H)
    shift = ln_b_ref[...].astype(jnp.float32) * one_plus_gamma + beta

    # --- LayerNorm statistics in f32 (biased variance, eps=1e-5) ---
    x = x_ref[0].astype(jnp.float32)                              # (TT, H)
    mean = jnp.mean(x, axis=-1, keepdims=True)
    xc = x - mean
    var = jnp.mean(xc * xc, axis=-1, keepdims=True)
    xhat = xc * jax.lax.rsqrt(var + LN_EPS)
    xm = xhat * scale + shift                                     # (TT, H)

    # --- final projection H -> O_pad on the MXU (f32 accumulation) ---
    y = (jnp.dot(xm.astype(w_ref.dtype), w_ref[...],
                 preferred_element_type=jnp.float32)
         + b_ref[...].astype(jnp.float32))                        # (TT, O_pad)
    o_ref[0] = y.astype(o_ref.dtype)


# ----------------------- wrapper -----------------------

def _pick_token_tile(T, cap=512):
    # Largest tile <= cap that divides T; multiples of 8 keep sublane alignment,
    # cap keeps the VMEM working set small enough for v7x's 64 MiB.
    for tt in (512, 256, 128, 64, 32, 16, 8):
        if tt <= cap and T % tt == 0:
            return tt
    return T


def final_layer_forward(x, c, params):
    B, T, H = x.shape
    w_lin = params["lin_w"]                                       # (H, O) == torch weight.T
    O = w_lin.shape[1]
    O_pad = max(128, ((O + 127) // 128) * 128)

    # Zero-pad the projection to a lane-dense width (multiple of 128) so output
    # stores are full-width vst instead of masked 16-lane stores.
    if O_pad != O:
        w_pad = jnp.pad(w_lin, ((0, 0), (0, O_pad - O)))
        b_pad = jnp.pad(params["lin_b"], (0, O_pad - O))
    else:
        w_pad, b_pad = w_lin, params["lin_b"]
    b_pad = b_pad.reshape(1, O_pad)

    ln_w = params["ln_w"].reshape(1, H)
    ln_b = params["ln_b"].reshape(1, H)
    mod_w = params["mod_w"]                                       # (H, 2H)
    mod_b = params["mod_b"].reshape(1, 2 * H)
    c3 = c.reshape(B, 1, H)

    TT = _pick_token_tile(T)
    nt = T // TT
    grid = (B, nt)

    itemsize = jnp.dtype(x.dtype).itemsize
    w_itemsize = jnp.dtype(w_lin.dtype).itemsize
    cost = pl.CostEstimate(
        flops=2 * B * T * H * O_pad + 2 * B * nt * H * (2 * H) + 8 * B * T * H,
        transcendentals=B * nt * H + B * T,                       # sigmoid + rsqrt
        bytes_accessed=(B * T * H * itemsize                      # x in
                        + B * T * O_pad * itemsize                # out
                        + B * H * itemsize                        # c
                        + (H * 2 * H + 2 * H + 2 * H + H * O_pad + O_pad) * w_itemsize),
    )

    out = pl.pallas_call(
        _final_layer_kernel,
        out_shape=jax.ShapeDtypeStruct((B, T, O_pad), x.dtype),
        grid=grid,
        in_specs=[
            pl.BlockSpec((1, TT, H), lambda b, t: (b, t, 0)),     # x token tile
            pl.BlockSpec((1, 1, H), lambda b, t: (b, 0, 0)),      # c (per batch)
            pl.BlockSpec((H, 2 * H), lambda b, t: (0, 0)),        # mod_w (resident)
            pl.BlockSpec((1, 2 * H), lambda b, t: (0, 0)),        # mod_b
            pl.BlockSpec((1, H), lambda b, t: (0, 0)),            # LN weight
            pl.BlockSpec((1, H), lambda b, t: (0, 0)),            # LN bias
            pl.BlockSpec((H, O_pad), lambda b, t: (0, 0)),        # lin weight (padded)
            pl.BlockSpec((1, O_pad), lambda b, t: (0, 0)),        # lin bias (padded)
        ],
        out_specs=pl.BlockSpec((1, TT, O_pad), lambda b, t: (b, t, 0)),
        compiler_params=pltpu.CompilerParams(
            dimension_semantics=("parallel", "parallel"),
            vmem_limit_bytes=48 * 1024 * 1024),
        cost_estimate=cost,
    )(x, c3, mod_w, mod_b, ln_w, ln_b, w_pad, b_pad)

    return out[..., :O] if O_pad != O else out


# ----------------------- pure-JAX reference -----------------------

def reference_forward(x, c, p):
    H = x.shape[-1]
    h = c * jax.nn.sigmoid(c)
    gb = h @ p["mod_w"] + p["mod_b"]
    gamma, beta = gb[:, :H], gb[:, H:]
    mean = x.mean(-1, keepdims=True)
    var = ((x - mean) ** 2).mean(-1, keepdims=True)
    xn = (x - mean) / jnp.sqrt(var + LN_EPS) * p["ln_w"] + p["ln_b"]
    xm = xn * (1.0 + gamma[:, None, :]) + beta[:, None, :]
    return xm @ p["lin_w"] + p["lin_b"]


# ----------------------- main -----------------------

if __name__ == "__main__":
    B, T = 2, 8
    hidden_size = 32
    out_channels = 4
    patch_size = 2
    O = out_channels * patch_size * patch_size                    # 16

    key = jax.random.PRNGKey(0)
    kx, kc, k1, k2, k3, k4, k5, k6 = jax.random.split(key, 8)

    x = jax.random.normal(kx, (B, T, hidden_size), jnp.float32)
    c = jax.random.normal(kc, (B, hidden_size), jnp.float32)

    # NOTE: the PyTorch module zero-inits the final linear (adaLN-Zero); nonzero
    # values are used here so the kernel is actually exercised.
    params = {
        "ln_w": 1.0 + 0.1 * jax.random.normal(k1, (hidden_size,), jnp.float32),
        "ln_b": 0.1 * jax.random.normal(k2, (hidden_size,), jnp.float32),
        "mod_w": 0.1 * jax.random.normal(k3, (hidden_size, 2 * hidden_size), jnp.float32),
        "mod_b": 0.1 * jax.random.normal(k4, (2 * hidden_size,), jnp.float32),
        "lin_w": 0.1 * jax.random.normal(k5, (hidden_size, O), jnp.float32),  # weight.T
        "lin_b": 0.1 * jax.random.normal(k6, (O,), jnp.float32),
    }

    # f32 path: tight check against the pure-JAX reference.
    out = jax.block_until_ready(final_layer_forward(x, c, params))
    ref = reference_forward(x, c, params)
    assert out.shape == (B, T, O), out.shape
    assert jnp.allclose(out, ref, atol=1e-4, rtol=1e-4), \
        float(jnp.max(jnp.abs(out - ref)))

    # bf16 bulk-data path (layer is HBM-bandwidth bound): relaxed tolerance.
    params_bf = dict(params,
                     mod_w=params["mod_w"].astype(jnp.bfloat16),
                     lin_w=params["lin_w"].astype(jnp.bfloat16),
                     lin_b=params["lin_b"].astype(jnp.bfloat16))
    x_bf = x.astype(jnp.bfloat16)
    c_bf = c.astype(jnp.bfloat16)
    out_bf = jax.block_until_ready(final_layer_forward(x_bf, c_bf, params_bf))
    ref_bf = reference_forward(
        x_bf.astype(jnp.float32), c_bf.astype(jnp.float32),
        {k: v.astype(jnp.float32) for k, v in params_bf.items()})
    assert out_bf.shape == (B, T, O), out_bf.shape
    assert jnp.allclose(out_bf.astype(jnp.float32), ref_bf, atol=1e-1, rtol=1e-1), \
        float(jnp.max(jnp.abs(out_bf.astype(jnp.float32) - ref_bf)))

    print("KERNEL_OK")
</pallas_src>

<mosaic_0001>
module attributes {stable_mosaic.version = 11 : i64} {
  func.func @_final_layer_kernel(%arg0: i32, %arg1: i32, %arg2: memref<1x8x32xf32, #tpu.memory_space<vmem>>, %arg3: memref<1x1x32xf32, #tpu.memory_space<vmem>>, %arg4: memref<32x64xf32, #tpu.memory_space<vmem>>, %arg5: memref<1x64xf32, #tpu.memory_space<vmem>>, %arg6: memref<1x32xf32, #tpu.memory_space<vmem>>, %arg7: memref<1x32xf32, #tpu.memory_space<vmem>>, %arg8: memref<32x128xf32, #tpu.memory_space<vmem>>, %arg9: memref<1x128xf32, #tpu.memory_space<vmem>>, %arg10: memref<1x8x128xf32, #tpu.memory_space<vmem>>) attributes {dimension_semantics = [#tpu.dimension_semantics<parallel>, #tpu.dimension_semantics<parallel>], iteration_bounds = array<i64: 2, 1>, scalar_prefetch = 0 : i64, scratch_operands = 0 : i64, tpu.core_type = #tpu.core_type<tc>, window_params = [{transform_indices = @transform_0, window_bounds = array<i64: 1, 8, 32>}, {transform_indices = @transform_1, window_bounds = array<i64: 1, 1, 32>}, {pipeline_mode = #tpu.pipeline_mode<synchronous>, transform_indices = @transform_2, window_bounds = array<i64: 32, 64>}, {pipeline_mode = #tpu.pipeline_mode<synchronous>, transform_indices = @transform_3, window_bounds = array<i64: 1, 64>}, {pipeline_mode = #tpu.pipeline_mode<synchronous>, transform_indices = @transform_4, window_bounds = array<i64: 1, 32>}, {pipeline_mode = #tpu.pipeline_mode<synchronous>, transform_indices = @transform_5, window_bounds = array<i64: 1, 32>}, {pipeline_mode = #tpu.pipeline_mode<synchronous>, transform_indices = @transform_6, window_bounds = array<i64: 32, 128>}, {pipeline_mode = #tpu.pipeline_mode<synchronous>, transform_indices = @transform_7, window_bounds = array<i64: 1, 128>}, {transform_indices = @transform_8, window_bounds = array<i64: 1, 8, 128>}]} {
    %c0 = arith.constant 0 : index
    %c0_0 = arith.constant 0 : index
    %c0_1 = arith.constant 0 : index
    %0 = vector.load %arg3[%c0, %c0_0, %c0_1] : memref<1x1x32xf32, #tpu.memory_space<vmem>>, vector<1x1x32xf32>
    %1 = vector.shape_cast %0 : vector<1x1x32xf32> to vector<1x32xf32>
    %2 = arith.negf %1 : vector<1x32xf32>
    %3 = math.exp %2 : vector<1x32xf32>
    %cst = arith.constant 1.000000e+00 : f32
    %4 = vector.broadcast %cst : f32 to vector<1x32xf32>
    %5 = arith.addf %4, %3 : vector<1x32xf32>
    %6 = arith.divf %4, %5 : vector<1x32xf32>
    %7 = arith.mulf %1, %6 : vector<1x32xf32>
    %c0_2 = arith.constant 0 : index
    %c0_3 = arith.constant 0 : index
    %8 = vector.load %arg4[%c0_2, %c0_3] : memref<32x64xf32, #tpu.memory_space<vmem>>, vector<32x64xf32>
    %cst_4 = arith.constant dense<0.000000e+00> : vector<1x64xf32>
    %9 = tpu.matmul %7, %8, %cst_4 {dimension_numbers = #tpu.dot_dimension_numbers<[1], [0], [0], [1], [0, 0, 1, 1], [], []>} : vector<1x32xf32>, vector<32x64xf32>, vector<1x64xf32> -> vector<1x64xf32>
    %c0_5 = arith.constant 0 : index
    %c0_6 = arith.constant 0 : index
    %10 = vector.load %arg5[%c0_5, %c0_6] : memref<1x64xf32, #tpu.memory_space<vmem>>, vector<1x64xf32>
    %11 = arith.addf %9, %10 : vector<1x64xf32>
    %12 = vector.extract_strided_slice %11 {offsets = [0, 0], sizes = [1, 32], strides = [1, 1]} : vector<1x64xf32> to vector<1x32xf32>
    %13 = vector.extract_strided_slice %11 {offsets = [0, 32], sizes = [1, 32], strides = [1, 1]} : vector<1x64xf32> to vector<1x32xf32>
    %cst_7 = arith.constant 1.000000e+00 : f32
    %14 = vector.broadcast %cst_7 : f32 to vector<1x32xf32>
    %15 = arith.addf %14, %12 : vector<1x32xf32>
    %c0_8 = arith.constant 0 : index
    %c0_9 = arith.constant 0 : index
    %16 = vector.load %arg6[%c0_8, %c0_9] : memref<1x32xf32, #tpu.memory_space<vmem>>, vector<1x32xf32>
    %17 = arith.mulf %16, %15 : vector<1x32xf32>
    %c0_10 = arith.constant 0 : index
    %c0_11 = arith.constant 0 : index
    %18 = vector.load %arg7[%c0_10, %c0_11] : memref<1x32xf32, #tpu.memory_space<vmem>>, vector<1x32xf32>
    %19 = arith.mulf %18, %15 : vector<1x32xf32>
    %20 = arith.addf %19, %13 : vector<1x32xf32>
    %c0_12 = arith.constant 0 : index
    %c0_13 = arith.constant 0 : index
    %c0_14 = arith.constant 0 : index
    %21 = vector.load %arg2[%c0_12, %c0_13, %c0_14] : memref<1x8x32xf32, #tpu.memory_space<vmem>>, vector<1x8x32xf32>
    %22 = vector.shape_cast %21 : vector<1x8x32xf32> to vector<8x32xf32>
    %cst_15 = arith.constant dense<0.000000e+00> : vector<8xf32>
    %23 = vector.multi_reduction <add>, %22, %cst_15 [1] : vector<8x32xf32> to vector<8xf32>
    %24 = vector.shape_cast %23 : vector<8xf32> to vector<8x1xf32>
    %cst_16 = arith.constant 3.200000e+01 : f32
    %25 = vector.broadcast %cst_16 : f32 to vector<8x1xf32>
    %26 = arith.divf %24, %25 : vector<8x1xf32>
    %27 = vector.broadcast %26 : vector<8x1xf32> to vector<8x32xf32>
    %28 = arith.subf %22, %27 : vector<8x32xf32>
    %29 = arith.mulf %28, %28 : vector<8x32xf32>
    %cst_17 = arith.constant dense<0.000000e+00> : vector<8xf32>
    %30 = vector.multi_reduction <add>, %29, %cst_17 [1] : vector<8x32xf32> to vector<8xf32>
    %31 = vector.shape_cast %30 : vector<8xf32> to vector<8x1xf32>
    %cst_18 = arith.constant 3.200000e+01 : f32
    %32 = vector.broadcast %cst_18 : f32 to vector<8x1xf32>
    %33 = arith.divf %31, %32 : vector<8x1xf32>
    %cst_19 = arith.constant 9.99999974E-6 : f32
    %34 = vector.broadcast %cst_19 : f32 to vector<8x1xf32>
    %35 = arith.addf %33, %34 : vector<8x1xf32>
    %36 = math.rsqrt %35 : vector<8x1xf32>
    %37 = vector.broadcast %36 : vector<8x1xf32> to vector<8x32xf32>
    %38 = arith.mulf %28, %37 : vector<8x32xf32>
    %39 = vector.broadcast %17 : vector<1x32xf32> to vector<8x32xf32>
    %40 = arith.mulf %38, %39 : vector<8x32xf32>
    %41 = vector.broadcast %20 : vector<1x32xf32> to vector<8x32xf32>
    %42 = arith.addf %40, %41 : vector<8x32xf32>
    %c0_20 = arith.constant 0 : index
    %c0_21 = arith.constant 0 : index
    %43 = vector.load %arg8[%c0_20, %c0_21] : memref<32x128xf32, #tpu.memory_space<vmem>>, vector<32x128xf32>
    %cst_22 = arith.constant dense<0.000000e+00> : vector<8x128xf32>
    %44 = tpu.matmul %42, %43, %cst_22 {dimension_numbers = #tpu.dot_dimension_numbers<[1], [0], [0], [1], [0, 0, 1, 1], [], []>} : vector<8x32xf32>, vector<32x128xf32>, vector<8x128xf32> -> vector<8x128xf32>
    %c0_23 = arith.constant 0 : index
    %c0_24 = arith.constant 0 : index
    %45 = vector.load %arg9[%c0_23, %c0_24] : memref<1x128xf32, #tpu.memory_space<vmem>>, vector<1x128xf32>
    %46 = vector.broadcast %45 : vector<1x128xf32> to vector<8x128xf32>
    %47 = arith.addf %44, %46 : vector<8x128xf32>
    %c0_25 = arith.constant 0 : index
    %c0_26 = arith.constant 0 : index
    %c0_27 = arith.constant 0 : index
    %48 = vector.load %arg10[%c0_25, %c0_26, %c0_27] : memref<1x8x128xf32, #tpu.memory_space<vmem>>, vector<1x8x128xf32>
    %49 = vector.shape_cast %48 : vector<1x8x128xf32> to vector<8x128xf32>
    %50 = vector.shape_cast %47 : vector<8x128xf32> to vector<1x8x128xf32>
    tpu.vector_store %arg10[%c0_25, %c0_26, %c0_27], %50 {strides = array<i32>} : memref<1x8x128xf32, #tpu.memory_space<vmem>>, vector<1x8x128xf32>,
    return
  }
  func.func @transform_0(%arg0: i32, %arg1: i32) -> (i32, i32, i32) {
    %c0_i32 = arith.constant 0 : i32
    %c0_i32_0 = arith.constant 0 : i32
    return %arg0, %arg1, %c0_i32 : i32, i32, i32
  }
  func.func @transform_1(%arg0: i32, %arg1: i32) -> (i32, i32, i32) {
    %c0_i32 = arith.constant 0 : i32
    %c0_i32_0 = arith.constant 0 : i32
    %c0_i32_1 = arith.constant 0 : i32
    return %arg0, %c0_i32, %c0_i32_0 : i32, i32, i32
  }
  func.func @transform_2(%arg0: i32, %arg1: i32) -> (i32, i32) {
    %c0_i32 = arith.constant 0 : i32
    %c0_i32_0 = arith.constant 0 : i32
    %c0_i32_1 = arith.constant 0 : i32
    return %c0_i32, %c0_i32_0 : i32, i32
  }
  func.func @transform_3(%arg0: i32, %arg1: i32) -> (i32, i32) {
    %c0_i32 = arith.constant 0 : i32
    %c0_i32_0 = arith.constant 0 : i32
    %c0_i32_1 = arith.constant 0 : i32
    return %c0_i32, %c0_i32_0 : i32, i32
  }
  func.func @transform_4(%arg0: i32, %arg1: i32) -> (i32, i32) {
    %c0_i32 = arith.constant 0 : i32
    %c0_i32_0 = arith.constant 0 : i32
    %c0_i32_1 = arith.constant 0 : i32
    return %c0_i32, %c0_i32_0 : i32, i32
  }
  func.func @transform_5(%arg0: i32, %arg1: i32) -> (i32, i32) {
    %c0_i32 = arith.constant 0 : i32
    %c0_i32_0 = arith.constant 0 : i32
    %c0_i32_1 = arith.constant 0 : i32
    return %c0_i32, %c0_i32_0 : i32, i32
  }
  func.func @transform_6(%arg0: i32, %arg1: i32) -> (i32, i32) {
    %c0_i32 = arith.constant 0 : i32
    %c0_i32_0 = arith.constant 0 : i32
    %c0_i32_1 = arith.constant 0 : i32
    return %c0_i32, %c0_i32_0 : i32, i32
  }
  func.func @transform_7(%arg0: i32, %arg1: i32) -> (i32, i32) {
    %c0_i32 = arith.constant 0 : i32
    %c0_i32_0 = arith.constant 0 : i32
    %c0_i32_1 = arith.constant 0 : i32
    return %c0_i32, %c0_i32_0 : i32, i32
  }
  func.func @transform_8(%arg0: i32, %arg1: i32) -> (i32, i32, i32) {
    %c0_i32 = arith.constant 0 : i32
    %c0_i32_0 = arith.constant 0 : i32
    return %arg0, %arg1, %c0_i32 : i32, i32, i32
  }
}

</mosaic_0001>

<bundles_post_ra>
// kernel: tpu_custom_call.1
= control target key start
LH: loop header
LB: loop body
LE: loop exit
PB: predicated region body
PF: predicated region fallthrough
CT: control target
= control target key end

     0   :  { %s1242_s0 = inlined_call_operand.hbm [shape: f32[2,8,32], index: 0, kind: input, shape index: {}]   ;;  %s1243_s1 = inlined_call_operand.hbm [shape: f32[2,1,32], index: 1, kind: input, shape index: {}]   ;;  %s1244_s2 = inlined_call_operand.hbm [shape: f32[32,64], index: 2, kind: input, shape index: {}]   ;;  %s1245_s3 = inlined_call_operand.vmem [shape: f32[1,64], index: 3, kind: input, shape index: {}]   ;;  %s1246_s4 = inlined_call_operand.vmem [shape: f32[1,32], index: 4, kind: input, shape index: {}]   ;;  %s1247_s5 = inlined_call_operand.vmem [shape: f32[1,32], index: 5, kind: input, shape index: {}]   ;;  %s1248_s6 = inlined_call_operand.hbm [shape: f32[32,128], index: 6, kind: input, shape index: {}]   ;;  %s1249_s7 = inlined_call_operand.vmem [shape: f32[1,128], index: 7, kind: input, shape index: {}]   ;;  %s1250_s8 = inlined_call_operand.hbm [shape: f32[2,8,128], index: 8, kind: output, shape index: {}]  }
   0x1   :  { %1257 = sst [smem:[#allocation22_spill]] %s1244_s2 }
   0x2   :  { %1258 = sst [smem:[#allocation23_spill]] %s1248_s6 }
   0x3   :  { %1259 = sst [smem:[#allocation24_spill]] %s1249_s7 }
   0x4   :  { %13 = vsyncpa [#allocation3], 0 }
   0x5   :  { %15 = vsyncpa [#allocation3 + $0x1], 0 }
   0x6   :  { %16 = vsyncpa [#allocation6], 0 }
   0x7   :  { %18 = vsyncpa [#allocation6 + $0x1], 0 }
   0x8   :  { %19 = vsyncpa [#allocation9], 0 }
   0x9   :  { %20 = vsyncpa [#allocation4], 0 }
   0xa   :  { %22 = vsyncpa [#allocation4 + $0x1], 0  ;;  %s1061_s27 = smov 0   ;;  %s1063_s28 = smov 0  }
   0xb   :  { %s1065_s29 = smov 0   ;;  %s1067_s30 = smov 0  }
   0xc   :  { %s1069_s9 = smov 0   ;;  %s1071_s10 = smov 0  }
   0xd LB: > { %1260 = sst [smem:[#allocation16_spill]] %s988_s27  ;;  %s1092_s11 = sadd.s32 4294967295, %s1008_s10   ;;  %s1008_s10 = sphi %s1071_s10, %s28_s10   ;;  %s1004_s9 = sphi %s1069_s9, %s1283_s9   ;;  %s1000_s30 = sphi %s1067_s30, %s1282_s30   ;;  %s996_s29 = sphi %s1065_s29, %s1278_s29   ;;  %s992_s28 = sphi %s1063_s28, %s1281_s28   ;;  %s988_s27 = sphi %s1061_s27, %s1280_s27  }
   0xe   : > { %1261 = sst [smem:[#allocation17_spill]] %s996_s29  ;;  %p675_p0 = scmp.ge.s32.totalorder %s1008_s10, 1 }
   0xf   : > { %p63_p1 = scmp.eq.s32.totalorder %s1092_s11, 0  ;;  %p253_p2 = scmp.lt.s32.totalorder %s1008_s10, 3 }
  0x10   : > { %s1262_s2 = sld [smem:[#allocation22_spill]]  ;;  %s1010_s16 = smov [#allocation7]  }
  0x11   : > { %p1100_p3 = pnand %p675_p0, %p253_p2  ;;  %s266_s17 = sshll.u32 %s1010_s16, 4  ;;  %s267_s17 = int_to_ptr.vmem [resolvable:$true] %s266_s17 }
  0x12   : > { %p678_p6 = scmp.ge.s32.totalorder %s1008_s10, 2  ;;  %s1264_s6 = sld [smem:[#allocation23_spill]] }
  0x13   : > { %p707_p4 = pneg %p1100_p3  ;;  %s1011_s21 = smov 128  }
  0x14   : > { %s1012_s22 = smov 8   ;;  %s1013_s23 = smov [#allocation8]  }
  0x15   : > { %p708_p5 = pnand %p707_p4, %p63_p1  ;;  %s289_s24 = sshll.u32 %s1013_s23, 4  ;;  %s290_s24 = int_to_ptr.vmem [resolvable:$true] %s289_s24 }
  0x16   : > { %s264_s14 = sshll.u32 %s1262_s2, 4  ;;  %s674_s25 = sadd.s32 4294967294, %s1008_s10   ;;  %s265_s14 = int_to_ptr.hbm [resolvable:$true] %s264_s14 }
  0x17   : > { %710 = dma.hbm_to_vmem [thread:$0]  (!%p708_p5), %s265_s14, 512, %s267_s17, [#allocation6], %s1011_s21, %s1011_s21, %s1012_s22  }
  0x18   : > { %s287_s20 = sshll.u32 %s1264_s6, 4  ;;  %s40_s26 = sadd.s32 1, %s1004_s9  ;;  %s288_s20 = int_to_ptr.hbm [resolvable:$true] %s287_s20 }
  0x19   : > { %713 = dma.hbm_to_vmem [thread:$0]  (!%p708_p5), %s288_s20, 512, %s290_s24, [#allocation9], %s1011_s21, %s1011_s21, %s1012_s22  }
  0x1a   : > { %p42_p7 = scmp.ge.s32.totalorder %s40_s26, 2  ;;  %s49_s12 = sadd.s32 1, %s996_s29 }
  0x1b   : > { %p56_p8 = scmp.ne.s32.totalorder %s996_s29, %s992_s28  ;;  %p57_p9 = scmp.eq.s32.totalorder %s1008_s10, 0 }
  0x1c   : > { %s1285_s26 = smov (%p42_p7, %s40_s26), 0  ;;  %p62_p11 = scmp.ne.s32.totalorder %s992_s28, %s988_s27 }
  0x1d   : > { %1265 = sst [smem:[#allocation18_spill]] %s1285_s26  ;;  %p1120_p10 = por %p57_p9, %p56_p8 }
  0x1e   : > { %s44_s14 = ssub.s32 %s1004_s9, %s1285_s26  ;;  %p240_p12 = scmp.eq.s32.totalorder %s1092_s11, 1 }
  0x1f   : > { %p47_p13 = scmp.eq.s32.totalorder %s44_s14, 0  ;;  %p1131_p0 = por %p63_p1, %p62_p11 }
  0x20   : > { %p1135_p2 = por %p240_p12, %p56_p8  ;;  %p246_p4 = scmp.eq.s32.totalorder %s674_s25, 1 }
  0x21   : > { %s1140_s18 = scalar_select %p47_p13, %s996_s29, %s49_s12  }
  0x22   : > { %s1268_s17 = scalar_select %p1135_p2, 1, 0 }
  0x23   : > { %1270 = sst [smem:[#allocation20_spill]] %s1140_s18  ;;  %p1142_p5 = por %p246_p4, %p62_p11 }
  0x24   : > { %1269 = sst [smem:[#allocation19_spill]] %s1268_s17  ;;  %p727_p7 = scmp.lt.s32.totalorder %s1008_s10, 2 }
  0x25   : > { %s1271_s19 = scalar_select %p1142_p5, 1, 0 }
  0x26   : > { %s306_s20 = sand.u32 1, %s996_s29   ;;  %s680_s21 = sshll.u32 %s1004_s9, 3 }
  0x27   : > { %1272 = sst [smem:[#allocation21_spill]] %s1271_s19  ;;  %s679_s22 = sshll.u32 %s306_s20, 3 }
  0x28   : > { %s315_s14 = scalar_lea.hbm %s1242_s0, %s680_s21  ;;  %s310_s6 = scalar_lea.vmem [#allocation2], %s679_s22 }
  0x29   : > { %s317_s2 = sshll.u32 %s315_s14, 4  ;;  %s319_s26 = sshll.u32 %s310_s6, 4  ;;  %s318_s2 = int_to_ptr.hbm [resolvable:$true] %s317_s2  ;;  %s320_s26 = int_to_ptr.vmem [resolvable:$true] %s319_s26 }
  0x2a   : > { %p715_p8 = pnand %p727_p7, %p1120_p10  ;;  %s326_s25 = sand.u32 1, %s1008_s10  }
  0x2b   : > { %s332_s19 = scalar_lea.hbm %s1243_s1, %s1004_s9  ;;  %s307_s27 = scalar_lea.sflag [#allocation3], %s306_s20 }
  0x2c   : > { %717 = dma.hbm_to_vmem [thread:$0]  (!%p715_p8), %s318_s2, 128, %s320_s26, %s307_s27  }
  0x2d   : > { %s334_s29 = sshll.u32 %s332_s19, 4  ;;  %s329_s7 = scalar_lea.vmem [#allocation5], %s306_s20  ;;  %s335_s29 = int_to_ptr.hbm [resolvable:$true] %s334_s29 }
  0x2e   : > { %s336_s17 = sshll.u32 %s329_s7, 4  ;;  %s327_s21 = scalar_lea.sflag [#allocation6], %s326_s25  ;;  %s337_s17 = int_to_ptr.vmem [resolvable:$true] %s336_s17 }
  0x2f   : > { %720 = dma.hbm_to_vmem [thread:$0]  (!%p715_p8), %s335_s29, 16, %s337_s17, %s327_s21  }
  0x30   : > { %345 = sbr.rel (%p1100_p3) target bundleno = 473 (0x1d9), region = 52  ;;  %s1162_s6 = sand.u32 (!%p1100_p3), 1, %s992_s28  }
  0x31   : > { %s682_s13 = sshll.u32 (!%p1100_p3), %s1162_s6, 3  ;;  %s348_s18 = scalar_lea.sflag (!%p1100_p3), [#allocation3], %s1162_s6 }
  0x32   : > { %s351_s2 = scalar_lea.vmem (!%p1100_p3), [#allocation2], %s682_s13 }
  0x35   : > { %967 = dma.done.wait (%p1131_p0), %s348_s18, 128  }
  0x36   : > { %969 = vsyncadd (%p1131_p0), %s348_s18, 4294967168  ;;  %s357_s7 = sand.u32 1, %s1092_s11   ;;  %s360_s29 = scalar_lea.vmem [#allocation5], %s1162_s6 }
  0x37   : > { %s358_s27 = scalar_lea.sflag [#allocation6], %s357_s7 }
  0x38   : > { %971 = dma.done.wait (%p1131_p0), %s358_s27, 16  }
  0x39   : > { %973 = vsyncadd (%p1131_p0), %s358_s27, 4294967280 }
  0x3a   : > { %975 = dma.done.wait (%p63_p1), [#allocation6], 512  }
  0x3b   : > { %977 = vsyncadd (%p63_p1), [#allocation6], 4294966784 }
  0x3c   : > { %979 = dma.done.wait (%p63_p1), [#allocation9], 512  }
  0x3d   : > { %981 = vsyncadd (%p63_p1), [#allocation9], 4294966784  ;;  %vm434_vm0 = vcmask 261120   ;;  %v468_v0 = vld [vmem:[%s351_s2] sm:$0xff]  ;;  %v429_v7 = vld [vmem:[#allocation7] sm:$0xff]  ;;  %v1014_v21 = vmov 32.0  }
  0x3e   : > { %v432_v1 = vld [vmem:[#allocation7 + $0x18] sm:$0xff]  ;;  %v431_v2 = vld [vmem:[#allocation7 + $0x10] sm:$0xff]  ;;  %v469_v3 = vsel %vm434_vm0, %v468_v0, 0.0  ;;  %v408_v4 = vld [vmem:[%s360_s29] sm:$0x1]  ;;  %s1015_s26 = smov 96  }
  0x3f   : > { %450 = vmatpush.msra.mxu0 %v432_v1  ;;  %470 = vadd.xlane.f32.xlu0 %v469_v3  ;;  %v430_v5 = vld [vmem:[#allocation7 + $0x8] sm:$0xff]  ;;  %v686_v6 = vmul.f32 -1.442695, %v408_v4  ;;  %v509_v36 = vld [vmem:[#allocation8 + $0x18] sm:$0xff]  ;;  %v508_v40 = vld [vmem:[#allocation8 + $0x10] sm:$0xff]  ;;  %s690_s22 = sshll.u32 %s1000_s30, 3 }
  0x40   : > { %v433_v33 = vld [vmem:[%s1245_s3] sm:$0x1]  ;;  %529 = vmatpush.msra.mxu1 %v509_v36  ;;  %v506_v42 = vld [vmem:[#allocation8] sm:$0xff]  ;;  %s550_s25 = scalar_lea.hbm %s1250_s8, %s690_s22  ;;  %s1274_s18 = sld [smem:[#allocation24_spill]] }
  0x41   : > { %451 = vmatpush.msra.mxu0 %v431_v2  ;;  %786 = vpow2.f32 %v686_v6  ;;  %v507_v41 = vld [vmem:[#allocation8 + $0x8] sm:$0xff]  ;;  %s407_s2 = scalar_lea.vmem [#allocation10], %s682_s13  ;;  %s554_s27 = sshll.u32 %s550_s25, 4  ;;  %s555_s27 = int_to_ptr.hbm [resolvable:$true] %s554_s27 }
  0x42   : > { %530 = vmatpush.msra.mxu1 %v508_v40  ;;  %v459_v50 = vld [vmem:[%s1246_s4] sm:$0x1]  ;;  %s552_s7 = sshll.u32 %s407_s2, 4  ;;  %s539_s29 = scalar_lea.sflag [#allocation4], %s1162_s6  ;;  %s553_s7 = int_to_ptr.vmem [resolvable:$true] %s552_s7 }
  0x43   : > { %452 = vmatpush.msra.mxu0 %v430_v5  ;;  %v461_v51 = vld [vmem:[%s1247_s5] sm:$0x1]  ;;  %s928_s30 = sshra.s32 %s555_s27, 4  ;;  %s934_s16 = scalar_lea.hbm %s1250_s8, 16  ;;  %s929_s30 = int_to_ptr.hbm [resolvable:$true] %s928_s30 }
  0x44   : > { %531 = vmatpush.msra.mxu1 %v507_v41  ;;  %s930_s11 = scalar_lea.hbm %s929_s30, 8  ;;  %p935_p10 = scmp.lt.s32.totalorder %s929_s30, %s1250_s8 }
  0x45   : > { %453 = vmatpush.msra.mxu0 %v429_v7  ;;  %p931_p1 = scmp.ne.s32.totalorder %s929_s30, %s930_s11  ;;  %p936_p11 = scmp.lt.s32.totalorder %s934_s16, %s930_s11 }
  0x46   : > { %532 = vmatpush.msra.mxu1 %v506_v42  ;;  %v785_v62 = vld [vmem:[%s1274_s18] ss:$0 sm:$0xff] }
  0x47   : > { %v787_v8 = vpop.eup %786  ;;  %p932_p3 = pnand %p931_p1, %p1135_p2  ;;  %p937_p12 = por %p936_p11, %p935_p10 }
  0x48   : > { %v412_v9 = vadd.f32 1.0, %v787_v8 }
  0x49   : > { %p933_p9 = pneg %p932_p3 }
  0x4a   : > { %788 = vrcp.f32 %v412_v9  ;;  %v424_v12 = vand.u32 2147483648, %v412_v9  ;;  %vm418_vm1 = vweird.f32 %v412_v9  ;;  %v422_v14 = vand.u32 2147483647, %v412_v9 }
  0x4b   : > { %790 = vrcp.f32 %v1014_v21  ;;  %p938_p13 = pnand %p937_p12, %p933_p9 }
  0x4c   : > { %v425_v16 = vor.u32 1.1754944e-38, %v424_v12  ;;  %vm423_vm4 = vcmp.eq.f32.partialorder %v422_v14, 8.507059e+37 }
  0x50   : > { %v789_v10 = vpop.eup %788 }
  0x51   : > { %v414_v11 = vmul.f32 %v789_v10, %v412_v9  ;;  %vm419_vm2 = vweird.f32 %v789_v10  ;;  %v791_v22 = vpop.eup %790 }
  0x52   : > { %vm420_vm3 = vmor %vm418_vm1, %vm419_vm2  ;;  %v473_v23 = vmul.f32 32.0, %v791_v22  ;;  %vm477_vm5 = vweird.f32 %v791_v22 }
  0x53   : > { %v415_v13 = vsub.f32 1.0, %v414_v11 }
  0x54   : > { %v474_v24 = vsub.f32 1.0, %v473_v23 }
  0x55   : > { %v416_v15 = vmul.f32 %v789_v10, %v415_v13 }
  0x56   : > { %v475_v25 = vmul.f32 %v791_v22, %v474_v24 }
  0x57   : > { %v417_v17 = vadd.f32 %v789_v10, %v416_v15 }
  0x58   : > { %v476_v26 = vadd.f32 %v791_v22, %v475_v25 }
  0x59   : > { %v421_v18 = vsel %vm420_vm3, %v789_v10, %v417_v17 }
  0x5a   : > { %v426_v19 = vsel %vm423_vm4, %v425_v16, %v421_v18  ;;  %v478_v27 = vsel %vm477_vm5, %v791_v22, %v476_v26 }
  0x5b   : > { %v428_v20 = vmul.f32 %v426_v19, %v408_v4 }
  0x5d   : > { %687 = vmatmul.msk.f32.vlgmr.msra.gmra.mxu0 %vm434_vm0, %v428_v20 }
  0xb2   : > { %v471_v28 = vpop.xlane.xlu0 %470 }
  0xb3   : > { %v479_v29 = vmul.f32 %v478_v27, %v471_v28 }
  0xb5   : > { %v480_v30 = vsub.f32 %v468_v0, %v479_v29 }
  0xb7   : > { %v481_v31 = vmul.f32 %v480_v30, %v480_v30 }
  0xb9   : > { %v482_v32 = vsel %vm434_vm0, %v481_v31, 0.0 }
  0xba   : > { %483 = vadd.xlane.f32.xlu0 %v482_v32 }
  0xda   : > { %v455_v34 = vpop.f32.mrf.mxu0 }
  0xdb   : > { %v456_v35 = vadd.f32 %v455_v34, %v433_v33 }
  0xdd   : > { %464 = vrot.lane.b32.xlu1 %v456_v35, %s1015_s26  ;;  %v458_v49 = vadd.f32 1.0, %v456_v35 }
  0xdf   : > { %v460_v53 = vmul.f32 %v459_v50, %v458_v49  ;;  %v462_v55 = vmul.f32 %v461_v51, %v458_v49 }
  0xe1   : > { %v499_v57 = vperm.slane %v460_v53, 0 }
 0x12d   : > { %v484_v37 = vpop.xlane.xlu0 %483 }
 0x12e   : > { %v485_v38 = vmul.f32 %v484_v37, %v478_v27 }
 0x130   : > { %v486_v39 = vadd.f32 1e-05, %v485_v38 }
 0x132   : > { %792 = vrsqrt.f32 %v486_v39  ;;  %vm493_vm6 = vweird.f32 %v486_v39 }
 0x138   : > { %v793_v43 = vpop.eup %792 }
 0x139   : > { %v488_v44 = vmul.f32 %v793_v43, %v486_v39  ;;  %vm494_vm7 = vweird.f32 %v793_v43 }
 0x13a   : > { %vm495_vm8 = vmor %vm493_vm6, %vm494_vm7 }
 0x13b   : > { %v489_v45 = vmul.f32 %v793_v43, %v488_v44 }
 0x13d   : > { %v490_v46 = vmul.f32 0.5, %v489_v45 }
 0x13f   : > { %v491_v47 = vsub.f32 1.5, %v490_v46 }
 0x141   : > { %v492_v48 = vmul.f32 %v793_v43, %v491_v47 }
 0x143   : > { %v496_v52 = vsel %vm495_vm8, %v793_v43, %v492_v48 }
 0x144   : > { %v497_v54 = vmul.f32 %v496_v52, %v480_v30 }
 0x146   : > { %v501_v59 = vmul.f32 %v499_v57, %v497_v54 }
 0x14f   : > { %v465_v56 = vpop.permute.xlu1 %464 }
 0x150   : > { %v467_v58 = vadd.f32 %v465_v56, %v462_v55 }
 0x152   : > { %v503_v60 = vperm.slane %v467_v58, 0 }
 0x154   : > { %v505_v61 = vadd.f32 %v503_v60, %v501_v59 }
 0x156   : > { %688 = vmatmul.msk.f32.vlgmr.msra.gmra.mxu1 %vm434_vm0, %v505_v61 }
 0x1d3   : > { %v534_v63 = vpop.f32.mrf.mxu1 }
 0x1d4   : > { %v535_v0 = vadd.f32 %v785_v62, %v534_v63 }
 0x1d6   : > { %537 = vst [vmem:[%s407_s2] sm:$0xff] %v535_v0 }
 0x1d7   : > { %941 = shalt.err (!%p938_p13)
}
 0x1d8   : > { %705 = dma.vmem_to_hbm [thread:$0]  (%p1135_p2), %s553_s7, 128, %s555_s27, %s539_s29  }
 0x1d9 PF: > { %s1275_s6 = sld [smem:[#allocation16_spill]]  ;;  %p722_p0 = pnand %p678_p6, %p1142_p5 }
 0x1db   : > { %p723_p4 = pneg %p722_p0 }
 0x1df   : > { %s566_s20 = sand.u32 1, %s1275_s6  }
 0x1e0   : > { %s567_s22 = scalar_lea.sflag [#allocation4], %s566_s20 }
 0x1e1   : > { %983 = dma.done.wait (%p723_p4), %s567_s22, 128  }
 0x1e2   : > { %985 = vsyncadd (%p723_p4), %s567_s22, 4294967168  ;;  %s28_s10 = sadd.s32 1, %s1008_s10   ;;  %s1277_s23 = sld [smem:[#allocation17_spill]] }
 0x1e3   : > { %p25_p7 = scmp.ge.s32.totalorder %s28_s10, 4   ;;  %s1278_s29 = sld [smem:[#allocation20_spill]] }
 0x1e4   : > { %s1279_s24 = sld [smem:[#allocation18_spill]]  ;;  %s1280_s27 = smov %s992_s28 }
 0x1e5   : > { %s1282_s30 = smov %s1004_s9 }
 0x1e6   :  { %27 = sbr.rel (!%p25_p7) target bundleno = 13 (0xd), region = 118 }
 0x1e8   : > { %s1281_s28 = smov %s1277_s23 }
 0x1ea   : > { %s1283_s9 = smov %s1279_s24 }
 0x1eb   :  { %573 = vsyncpa [#allocation3], 1 }
 0x1ec   :  { %575 = vsyncpa [#allocation3 + $0x1], 1 }
 0x1ed   :  { %576 = vsyncpa [#allocation6], 1 }
 0x1ee   :  { %578 = vsyncpa [#allocation6 + $0x1], 1 }
 0x1ef   :  { %579 = vsyncpa [#allocation9], 1 }
 0x1f0   :  { %580 = vsyncpa [#allocation4], 1 }
 0x1f1   :  { %582 = vsyncpa [#allocation4 + $0x1], 1 }

</bundles_post_ra>
